<compile_context>
chip_gen: v6e
topology: v6e:2x2x1
jax: 0.10.0
libtpu: 0.0.40
codegen_flags: <defaults>
</compile_context>

<pallas_src>
import jax
import jax.numpy as jnp
from jax.experimental import pallas as pl
from jax.experimental.pallas import tpu as pltpu


def _round_up(x, m):
    return (x + m - 1) // m * m


# --------------------------------------------------------------------------
# kernel
# --------------------------------------------------------------------------
def _lora_qkv_kernel(x_ref, wqkv_ref, bias_ref, a_all_ref, b_pack_ref, out_ref):
    x = x_ref[...]                                                  # (TM, C) bf16

    # base projection: (TM, C) x (C, 3C) on the MXU, f32 accumulation
    qkv = jnp.dot(x, wqkv_ref[...], preferred_element_type=jnp.float32)

    # fused LoRA down-projection: all four adapters in one (C, Rp) matmul
    h = jnp.dot(x, a_all_ref[...], preferred_element_type=jnp.float32)   # (TM, Rp)

    # fused LoRA up-projection: B adapters packed into (Rp, 3C) with zero
    # K columns, so this lands dq in [0,C) and dv in [2C,3C) directly.
    dqkv = jnp.dot(h.astype(b_pack_ref.dtype), b_pack_ref[...],
                   preferred_element_type=jnp.float32)                   # (TM, 3C)

    # lane-dense epilogue: one VPU add, one unmasked store, no slicing/concat
    out_ref[...] = (qkv + dqkv + bias_ref[...]).astype(out_ref.dtype)


# --------------------------------------------------------------------------
# one-time weight packing (analogue of change_lora / module construction)
# --------------------------------------------------------------------------
def prepare_qkv_params(params, compute_dtype=jnp.bfloat16):
    """Pre-transpose + pack weights once; do NOT call this per forward."""
    C = params["w_qkv"].shape[1]
    r = params["a_q"].shape[0]
    Rp = _round_up(4 * r, 128)                         # pad to full lane width

    wqkv_t = params["w_qkv"].T.astype(compute_dtype)                 # (C, 3C)
    bias = params["b_qkv"].reshape(1, 3 * C).astype(jnp.float32)     # (1, 3C)

    # pack all four A adapters side-by-side -> single (C, Rp) down-projection
    a_all = jnp.concatenate(
        [params["a_q"].T, params["new_a_q"].T,
         params["a_v"].T, params["new_a_v"].T], axis=1)              # (C, 4r)
    a_all = jnp.pad(a_all, ((0, 0), (0, Rp - 4 * r))).astype(compute_dtype)

    # pack B adapters into (Rp, 3C): q adapters hit cols [0, C), v adapters
    # hit [2C, 3C); K columns stay zero so qkv + h @ b_pack is exact.
    b_pack = jnp.zeros((Rp, 3 * C), jnp.float32)
    b_pack = b_pack.at[0 * r:1 * r, 0:C].set(params["b_q"].T)
    b_pack = b_pack.at[1 * r:2 * r, 0:C].set(params["new_b_q"].T)
    b_pack = b_pack.at[2 * r:3 * r, 2 * C:3 * C].set(params["b_v"].T)
    b_pack = b_pack.at[3 * r:4 * r, 2 * C:3 * C].set(params["new_b_v"].T)
    b_pack = b_pack.astype(compute_dtype)

    return {"wqkv_t": wqkv_t, "bias": bias, "a_all": a_all,
            "b_pack": b_pack, "C": C, "Rp": Rp}


# --------------------------------------------------------------------------
# forward wrapper
# --------------------------------------------------------------------------
def lora_qkv(x, prepped, *, tile_m=256):
    """x: (B, N, C) float32.  Returns (B, N, 3C) matching _LoRA_qkv_timm_x."""
    B, N, C = x.shape
    assert C == prepped["C"]
    Rp = prepped["Rp"]
    M = B * N

    # tile rows; pad M so every grid step sees a full, aligned block
    TM = min(tile_m, _round_up(M, 8))
    Mp = _round_up(M, TM)

    x2d = x.reshape(M, C).astype(prepped["wqkv_t"].dtype)
    if Mp != M:
        x2d = jnp.pad(x2d, ((0, Mp - M), (0, 0)))

    wqkv_t = prepped["wqkv_t"]
    bias = prepped["bias"]
    a_all = prepped["a_all"]
    b_pack = prepped["b_pack"]

    itemsize = jnp.dtype(wqkv_t.dtype).itemsize
    flops = 2 * Mp * C * 3 * C + 2 * Mp * C * Rp + 2 * Mp * Rp * 3 * C
    bytes_accessed = (x2d.size * itemsize
                      + wqkv_t.size * itemsize
                      + a_all.size * itemsize
                      + b_pack.size * itemsize
                      + bias.size * 4
                      + Mp * 3 * C * 4)

    # explicit VMEM budget: double-buffered x/out tiles + resident weights
    vmem_need = (2 * (TM * C * itemsize + TM * 3 * C * 4)
                 + 2 * ((C * 3 * C + C * Rp + Rp * 3 * C) * itemsize + 3 * C * 4)
                 + (2 << 20))
    vmem_limit = int(min(max(vmem_need, 16 << 20), 48 << 20))

    out = pl.pallas_call(
        _lora_qkv_kernel,
        out_shape=jax.ShapeDtypeStruct((Mp, 3 * C), jnp.float32),
        grid=(Mp // TM,),
        in_specs=[
            pl.BlockSpec((TM, C), lambda i: (i, 0)),          # x row tile
            pl.BlockSpec((C, 3 * C), lambda i: (0, 0)),       # Wqkv^T (resident)
            pl.BlockSpec((1, 3 * C), lambda i: (0, 0)),       # bias   (resident)
            pl.BlockSpec((C, Rp), lambda i: (0, 0)),          # packed A (resident)
            pl.BlockSpec((Rp, 3 * C), lambda i: (0, 0)),      # packed B (resident)
        ],
        out_specs=pl.BlockSpec((TM, 3 * C), lambda i: (i, 0)),
        compiler_params=pltpu.CompilerParams(
            dimension_semantics=("parallel",),                # megacore on v7x
            vmem_limit_bytes=vmem_limit),
        cost_estimate=pl.CostEstimate(
            flops=flops, transcendentals=0, bytes_accessed=bytes_accessed),
    )(x2d, wqkv_t, bias, a_all, b_pack)

    return out[:M].reshape(B, N, 3 * C)


# --------------------------------------------------------------------------
# pure-JAX reference mirroring the PyTorch forward exactly (f32)
# --------------------------------------------------------------------------
def lora_qkv_reference(x, params):
    C = x.shape[-1]
    qkv = x @ params["w_qkv"].T + params["b_qkv"]
    new_q = (x @ params["a_q"].T) @ params["b_q"].T
    new_v = (x @ params["a_v"].T) @ params["b_v"].T
    new_q = new_q + (x @ params["new_a_q"].T) @ params["new_b_q"].T
    new_v = new_v + (x @ params["new_a_v"].T) @ params["new_b_v"].T
    qkv = qkv.at[:, :, :C].add(new_q)
    qkv = qkv.at[:, :, -C:].add(new_v)
    return qkv


def make_params(key, C, r):
    """Deterministic synthetic init (shapes from the module's __init__)."""
    ks = jax.random.split(key, 10)
    scale = 0.05
    return {
        "w_qkv":   jax.random.normal(ks[0], (3 * C, C), jnp.float32) * scale,
        "b_qkv":   jax.random.normal(ks[1], (3 * C,), jnp.float32) * scale,
        "a_q":     jax.random.normal(ks[2], (r, C), jnp.float32) * scale,
        "b_q":     jax.random.normal(ks[3], (C, r), jnp.float32) * scale,
        "a_v":     jax.random.normal(ks[4], (r, C), jnp.float32) * scale,
        "b_v":     jax.random.normal(ks[5], (C, r), jnp.float32) * scale,
        "new_a_q": jax.random.normal(ks[6], (r, C), jnp.float32) * scale,
        "new_b_q": jax.random.normal(ks[7], (C, r), jnp.float32) * scale,
        "new_a_v": jax.random.normal(ks[8], (r, C), jnp.float32) * scale,
        "new_b_v": jax.random.normal(ks[9], (C, r), jnp.float32) * scale,
    }


if __name__ == "__main__":
    B, N, C, r = 2, 8, 32, 4   # batch, seq tokens, hidden dim, LoRA rank

    key = jax.random.PRNGKey(0)
    kx, kp = jax.random.split(key)
    x = jax.random.normal(kx, (B, N, C), jnp.float32)
    params = make_params(kp, C, r)

    prepped = prepare_qkv_params(params)      # one-time packing (like change_lora)
    out = jax.block_until_ready(lora_qkv(x, prepped))

    ref = lora_qkv_reference(x, params)
    assert out.shape == (B, N, 3 * C)
    # bf16 matmul inputs vs f32 reference -> slightly relaxed tolerance
    assert jnp.allclose(out, ref, atol=2e-2, rtol=2e-2), "mismatch vs reference"

    print("KERNEL_OK")
</pallas_src>

<mosaic_0001>
module attributes {stable_mosaic.version = 11 : i64} {
  func.func @_lora_qkv_kernel(%arg0: i32, %arg1: memref<16x32xbf16, #tpu.memory_space<vmem>>, %arg2: memref<32x96xbf16, #tpu.memory_space<vmem>>, %arg3: memref<1x96xf32, #tpu.memory_space<vmem>>, %arg4: memref<32x128xbf16, #tpu.memory_space<vmem>>, %arg5: memref<128x96xbf16, #tpu.memory_space<vmem>>, %arg6: memref<16x96xf32, #tpu.memory_space<vmem>>) attributes {dimension_semantics = [#tpu.dimension_semantics<parallel>], iteration_bounds = array<i64: 1>, scalar_prefetch = 0 : i64, scratch_operands = 0 : i64, tpu.core_type = #tpu.core_type<tc>, window_params = [{transform_indices = @transform_0, window_bounds = array<i64: 16, 32>}, {pipeline_mode = #tpu.pipeline_mode<synchronous>, transform_indices = @transform_1, window_bounds = array<i64: 32, 96>}, {pipeline_mode = #tpu.pipeline_mode<synchronous>, transform_indices = @transform_2, window_bounds = array<i64: 1, 96>}, {pipeline_mode = #tpu.pipeline_mode<synchronous>, transform_indices = @transform_3, window_bounds = array<i64: 32, 128>}, {pipeline_mode = #tpu.pipeline_mode<synchronous>, transform_indices = @transform_4, window_bounds = array<i64: 128, 96>}, {transform_indices = @transform_5, window_bounds = array<i64: 16, 96>}]} {
    %c0 = arith.constant 0 : index
    %c0_0 = arith.constant 0 : index
    %0 = vector.load %arg1[%c0, %c0_0] : memref<16x32xbf16, #tpu.memory_space<vmem>>, vector<16x32xbf16>
    %c0_1 = arith.constant 0 : index
    %c0_2 = arith.constant 0 : index
    %1 = vector.load %arg2[%c0_1, %c0_2] : memref<32x96xbf16, #tpu.memory_space<vmem>>, vector<32x96xbf16>
    %cst = arith.constant dense<0.000000e+00> : vector<16x96xf32>
    %2 = tpu.matmul %0, %1, %cst {dimension_numbers = #tpu.dot_dimension_numbers<[1], [0], [0], [1], [0, 0, 1, 1], [], []>} : vector<16x32xbf16>, vector<32x96xbf16>, vector<16x96xf32> -> vector<16x96xf32>
    %c0_3 = arith.constant 0 : index
    %c0_4 = arith.constant 0 : index
    %3 = vector.load %arg4[%c0_3, %c0_4] : memref<32x128xbf16, #tpu.memory_space<vmem>>, vector<32x128xbf16>
    %cst_5 = arith.constant dense<0.000000e+00> : vector<16x128xf32>
    %4 = tpu.matmul %0, %3, %cst_5 {dimension_numbers = #tpu.dot_dimension_numbers<[1], [0], [0], [1], [0, 0, 1, 1], [], []>} : vector<16x32xbf16>, vector<32x128xbf16>, vector<16x128xf32> -> vector<16x128xf32>
    %5 = arith.truncf %4 : vector<16x128xf32> to vector<16x128xbf16>
    %c0_6 = arith.constant 0 : index
    %c0_7 = arith.constant 0 : index
    %6 = vector.load %arg5[%c0_6, %c0_7] : memref<128x96xbf16, #tpu.memory_space<vmem>>, vector<128x96xbf16>
    %cst_8 = arith.constant dense<0.000000e+00> : vector<16x96xf32>
    %7 = tpu.matmul %5, %6, %cst_8 {dimension_numbers = #tpu.dot_dimension_numbers<[1], [0], [0], [1], [0, 0, 1, 1], [], []>} : vector<16x128xbf16>, vector<128x96xbf16>, vector<16x96xf32> -> vector<16x96xf32>
    %8 = arith.addf %2, %7 : vector<16x96xf32>
    %c0_9 = arith.constant 0 : index
    %c0_10 = arith.constant 0 : index
    %9 = vector.load %arg3[%c0_9, %c0_10] : memref<1x96xf32, #tpu.memory_space<vmem>>, vector<1x96xf32>
    %10 = vector.broadcast %9 : vector<1x96xf32> to vector<16x96xf32>
    %11 = arith.addf %8, %10 : vector<16x96xf32>
    %c0_11 = arith.constant 0 : index
    %c0_12 = arith.constant 0 : index
    %12 = vector.load %arg6[%c0_11, %c0_12] : memref<16x96xf32, #tpu.memory_space<vmem>>, vector<16x96xf32>
    tpu.vector_store %arg6[%c0_11, %c0_12], %11 {strides = array<i32>} : memref<16x96xf32, #tpu.memory_space<vmem>>, vector<16x96xf32>,
    return
  }
  func.func @transform_0(%arg0: i32) -> (i32, i32) {
    %c0_i32 = arith.constant 0 : i32
    %c0_i32_0 = arith.constant 0 : i32
    return %arg0, %c0_i32 : i32, i32
  }
  func.func @transform_1(%arg0: i32) -> (i32, i32) {
    %c0_i32 = arith.constant 0 : i32
    %c0_i32_0 = arith.constant 0 : i32
    %c0_i32_1 = arith.constant 0 : i32
    return %c0_i32, %c0_i32_0 : i32, i32
  }
  func.func @transform_2(%arg0: i32) -> (i32, i32) {
    %c0_i32 = arith.constant 0 : i32
    %c0_i32_0 = arith.constant 0 : i32
    %c0_i32_1 = arith.constant 0 : i32
    return %c0_i32, %c0_i32_0 : i32, i32
  }
  func.func @transform_3(%arg0: i32) -> (i32, i32) {
    %c0_i32 = arith.constant 0 : i32
    %c0_i32_0 = arith.constant 0 : i32
    %c0_i32_1 = arith.constant 0 : i32
    return %c0_i32, %c0_i32_0 : i32, i32
  }
  func.func @transform_4(%arg0: i32) -> (i32, i32) {
    %c0_i32 = arith.constant 0 : i32
    %c0_i32_0 = arith.constant 0 : i32
    %c0_i32_1 = arith.constant 0 : i32
    return %c0_i32, %c0_i32_0 : i32, i32
  }
  func.func @transform_5(%arg0: i32) -> (i32, i32) {
    %c0_i32 = arith.constant 0 : i32
    %c0_i32_0 = arith.constant 0 : i32
    return %arg0, %c0_i32 : i32, i32
  }
}

</mosaic_0001>

<bundles_post_ra>
// kernel: tpu_custom_call.1
= control target key start
LH: loop header
LB: loop body
LE: loop exit
PB: predicated region body
PF: predicated region fallthrough
CT: control target
= control target key end

     0   :  { %v388_v1 = vmov 0.0   ;;  %vm389_vm0 = vmmov 0   ;;  %vm49_vm1 = vcmask 261120   ;;  %s473_s0 = inlined_call_operand.vmem [shape: bf16[16,32], index: 0, kind: input, shape index: {}]   ;;  %s474_s1 = inlined_call_operand.vmem [shape: bf16[32,96], index: 1, kind: input, shape index: {}]   ;;  %s475_s2 = inlined_call_operand.vmem [shape: f32[1,96], index: 2, kind: input, shape index: {}]   ;;  %s476_s3 = inlined_call_operand.vmem [shape: bf16[32,128], index: 3, kind: input, shape index: {}]   ;;  %s477_s4 = inlined_call_operand.vmem [shape: bf16[128,96], index: 4, kind: input, shape index: {}]   ;;  %s478_s5 = inlined_call_operand.hbm [shape: f32[16,96], index: 5, kind: output, shape index: {}]  }
   0x1   :  { %v353_v0 = vld [vmem:[%s476_s3 + $0x8] sm:$0xff]   ;;  %312 = vmatprep.subr.bf16.mxu0 %v388_v1  ;;  %320 = vmatprep.subr.bf16.mxu1 %v388_v1  ;;  %v354_v2 = vld [vmem:[%s476_s3] sm:$0xff]   ;;  %v356_v3 = vld [vmem:[%s477_s4 + $0x38] sm:$0xff]  }
   0x2   :  { %313 = vmatpush3.bf16.msra.mxu0 %v353_v0  ;;  %316 = vmatprep.mubr.msk.bf16.mxu0 %vm389_vm0, %v388_v1  ;;  %v355_v4 = vld [vmem:[%s473_s0] sm:$0xff]   ;;  %v357_v5 = vld [vmem:[%s477_s4 + $0x30] sm:$0xff]   ;;  %v361_v6 = vld [vmem:[%s474_s1 + $0x8] sm:$0xff]  }
   0x3   :  { %314 = vmatprep.subr.bf16.mxu0 %v388_v1  ;;  %336 = vmatprep.mubr.msk.bf16.mxu1 %vm389_vm0, %v388_v1  ;;  %v358_v7 = vld [vmem:[%s477_s4 + $0x28] sm:$0xff]   ;;  %v363_v8 = vld [vmem:[%s474_s1] sm:$0xff]  }
   0x4   :  { %321 = vmatpush3.bf16.msra.mxu1 %v356_v3 }
   0x5   :  { %322 = vmatprep.subr.bf16.mxu1 %v388_v1 }
   0x6   :  { %315 = vmatpush3.bf16.msra.mxu0 %v354_v2 }
   0x7   :  { %340 = vmatprep.subr.bf16.mxu0 %v388_v1 }
   0x8   :  { %323 = vmatpush3.bf16.msra.mxu1 %v357_v5 }
   0x9   :  { %317 = vmatmul.mubr.msk.bf16.vlgmr.msra.gmra.mxu0 %vm49_vm1, %v355_v4  ;;  %324 = vmatprep.subr.bf16.mxu1 %v388_v1 }
   0xa   :  { %341 = vmatpush3.bf16.msra.mxu0 %v361_v6  ;;  %344 = vmatprep.mubr.msk.bf16.mxu0 %vm389_vm0, %v388_v1 }
   0xb   :  { %342 = vmatprep.subr.bf16.mxu0 %v388_v1 }
   0xc   :  { %10 = vsyncpa [#allocation3], 0  ;;  %325 = vmatpush3.bf16.msra.mxu1 %v358_v7  ;;  %v359_v9 = vld [vmem:[%s477_s4 + $0x20] sm:$0xff]   ;;  %v360_v10 = vld [vmem:[%s477_s4 + $0x18] sm:$0xff]   ;;  %vm262_vm2 = vcmask 785408  }
   0xd   :  { %326 = vmatprep.subr.bf16.mxu1 %v388_v1  ;;  %v362_v11 = vld [vmem:[%s477_s4 + $0x10] sm:$0xff]   ;;  %v364_v12 = vld [vmem:[%s477_s4 + $0x8] sm:$0xff]   ;;  %v365_v13 = vld [vmem:[%s477_s4] sm:$0xff]   ;;  %s390_s4 = smov [#allocation2]  }
   0xe   :  { %343 = vmatpush3.bf16.msra.mxu0 %v363_v8  ;;  %v296_v24 = vld [vmem:[%s475_s2] ss:$0 sm:$0xff]  ;;  %s270_s18 = sshll.u32 %s390_s4, 4  ;;  %s271_s18 = int_to_ptr.vmem [resolvable:$true] %s270_s18 }
   0xf   :  { %s366_s19 = scalar_lea.vmem %s271_s18, 256  ;;  %p371_p1 = scmp.lt.s32.totalorder %s271_s18, %s271_s18 }
  0x10   :  { %327 = vmatpush3.bf16.msra.mxu1 %v359_v9  ;;  %p367_p0 = scmp.ne.s32.totalorder %s271_s18, %s366_s19  ;;  %p372_p2 = scmp.lt.s32.totalorder %s366_s19, %s366_s19 }
  0x11   :  { %345 = vmatmul.mubr.msk.bf16.vlgmr.msra.gmra.mxu0 %vm49_vm1, %v355_v4  ;;  %328 = vmatprep.subr.bf16.mxu1 %v388_v1 }
  0x12   :  { %p373_p3 = por %p372_p2, %p371_p1 }
  0x14   :  { %329 = vmatpush3.bf16.msra.mxu1 %v360_v10  ;;  %p374_p4 = pnand %p373_p3, %p367_p0 }
  0x15   :  { %330 = vmatprep.subr.bf16.mxu1 %v388_v1 }
  0x18   :  { %331 = vmatpush3.bf16.msra.mxu1 %v362_v11 }
  0x19   :  { %332 = vmatprep.subr.bf16.mxu1 %v388_v1 }
  0x1c   :  { %333 = vmatpush3.bf16.msra.mxu1 %v364_v12 }
  0x1d   :  { %334 = vmatprep.subr.bf16.mxu1 %v388_v1 }
  0x20   :  { %335 = vmatpush3.bf16.msra.mxu1 %v365_v13 }
  0xc9   :  { %v87_v14 = vpop.f32.mrf.mxu0 }
  0xcb   :  { %v318_v15 = vpop.f32.mrf.mxu0 }
  0xcd   :  { %v90_v16 = vpop.f32.mrf.mxu0 }
  0xce   :  { %v94_v17 = vpack.c.bf16 %v90_v16, %v87_v14 }
  0xcf   :  { %v319_v18 = vpop.f32.mrf.mxu0 }
  0xd0   :  { %337 = vmatmul.mubr.bf16.vlgmr.msra.gmra.mxu1 %v94_v17 }
  0xd1   :  { %v246_v19 = vpop.f32.mrf.mxu0 }
  0xd3   :  { %v346_v20 = vpop.f32.mrf.mxu0 }
  0xd5   :  { %v249_v21 = vpop.f32.mrf.mxu0 }
  0xd7   :  { %v347_v22 = vpop.f32.mrf.mxu0 }
 0x190   :  { %v193_v23 = vpop.f32.mrf.mxu1 }
 0x191   :  { %v247_v25 = vadd.f32 %v246_v19, %v193_v23 }
 0x192   :  { %v338_v26 = vpop.f32.mrf.mxu1 }
 0x193   :  { %v260_v27 = vadd.f32 %v296_v24, %v247_v25 }
 0x194   :  { %v196_v28 = vpop.f32.mrf.mxu1 }
 0x195   :  { %263 = vst.msk [vmem:[#allocation2] sm:$0xff] %vm262_vm2, %v260_v27  ;;  %v250_v29 = vadd.f32 %v249_v21, %v196_v28 }
 0x196   :  { %v339_v30 = vpop.f32.mrf.mxu1 }
 0x197   :  { %v261_v31 = vadd.f32 %v296_v24, %v250_v29 }
 0x199   :  { %264 = vst.msk [vmem:[#allocation2 + $0x8] sm:$0xff] %vm262_vm2, %v261_v31 }
 0x19a   :  { %377 = shalt.err (!%p374_p4)
}
 0x19b   :  { %s391_s2 = smov 128   ;;  %s392_s20 = smov 8  }
 0x19c   :  { %276 = dma.vmem_to_hbm [thread:$0]  %s271_s18, 256, %s478_s5, [#allocation3], %s391_s2, %s391_s2, %s392_s20  }
 0x19d   :  { %386 = dma.done.wait [#allocation3], 256  }
 0x19e   :  { %387 = vsyncadd [#allocation3], 4294967040 }
 0x19f   :  { %280 = vsyncpa [#allocation3], 1 }

</bundles_post_ra>
